<compile_context>
chip_gen: v7x
topology: tpu7x:2x2x1
jax: 0.10.0
libtpu: 0.0.40
codegen_flags: <defaults>
</compile_context>

<pallas_src>
import math
import functools

import numpy as np
import jax
import jax.numpy as jnp
from jax.experimental import pallas as pl
from jax.experimental.pallas import tpu as pltpu


# ---------------------------------------------------------------------------
# Host-side scalar math: R-MAC region grid, identical to cirtorch LF.roipool.
# Returns a list of (row0, col0, h_size, w_size); first entry = full map.
# ---------------------------------------------------------------------------
def rmac_regions(H, W, L=3):
    ovr = 0.4
    steps = np.array([2, 3, 4, 5, 6, 7], dtype=np.float64)
    w = min(W, H)
    b = (max(H, W) - w) / (steps - 1)
    idx = int(np.argmin(np.abs(((w ** 2 - w * b) / (w ** 2)) - ovr)))
    Wd, Hd = 0, 0
    if H < W:
        Wd = idx + 1
    elif H > W:
        Hd = idx + 1

    regions = [(0, 0, H, W)]  # rpool(x) over the whole map (first vec in roipool)
    for l in range(1, L + 1):
        wl = int(math.floor(2 * w / (l + 1)))
        wl2 = int(math.floor(wl / 2 - 1))
        b = 0.0 if (l + Wd) == 1 else (W - wl) / (l + Wd - 1)
        cenW = (np.floor(wl2 + np.arange(l - 1 + Wd + 1) * b) - wl2).astype(int)
        b = 0.0 if (l + Hd) == 1 else (H - wl) / (l + Hd - 1)
        cenH = (np.floor(wl2 + np.arange(l - 1 + Hd + 1) * b) - wl2).astype(int)
        for i_ in cenH.tolist():
            for j_ in cenW.tolist():
                if wl == 0:
                    continue
                regions.append((i_, j_, wl, wl))
    return regions


def _pow_int_chain(x, n):
    """x**n for a static positive int n as a multiply chain (VPU only, no EUP)."""
    acc = None
    while True:
        if n & 1:
            acc = x if acc is None else acc * x
        n >>= 1
        if n == 0:
            return acc
        x = x * x


# ---------------------------------------------------------------------------
# Pallas kernel.  Grid = (batch, C-tiles, HW-tiles); HW-tile axis is the
# reduction.  The output block is resident across it and accumulated in place.
#   x_ref : [1, Ct, tk]  feature-map tile (native dtype; cast to f32 here)
#   m_ref : [HWp, R]     resident exact-0/1 bf16 region mask (DMA'd once)
#   o_ref : [1, Ct, R]   f32 accumulator: sum_{hw in region} clamp(x,eps)^p
# ---------------------------------------------------------------------------
def _rpool_pool_kernel(x_ref, m_ref, o_ref, *, p, eps, hw, tk):
    k = pl.program_id(2)

    @pl.when(k == 0)
    def _init():
        o_ref[...] = jnp.zeros_like(o_ref)

    x = x_ref[0].astype(jnp.float32)                       # [Ct, tk]

    # Ragged last HW tile: lanes beyond HW may contain DMA garbage (NaN*0
    # would still be NaN), so force them to eps explicitly.
    if hw % tk != 0:
        lane = jax.lax.broadcasted_iota(jnp.int32, x.shape, 1)
        x = jnp.where(k * tk + lane < hw, x, eps)

    xc = jnp.maximum(x, eps)
    p_int = int(round(p))
    if abs(p - p_int) < 1e-12 and p_int >= 1:
        xp = _pow_int_chain(xc, p_int)                     # p=3 -> xc*xc*xc (f32 VPU)
    else:
        xp = jnp.exp(p * jnp.log(xc))                      # generic p fallback (EUP)

    # bf16 x bf16 -> f32 accumulate: single MXU pass.  Mask is exact 0/1 in
    # bf16, so only the LHS cast (~2^-9 rel) affects the result.
    start = pl.multiple_of(k * tk, 128)
    m = m_ref[pl.ds(start, tk), :]                         # [tk, R], no re-DMA
    o_ref[0] += jnp.dot(xp.astype(jnp.bfloat16), m,
                        preferred_element_type=jnp.float32)


# ---------------------------------------------------------------------------
# Wrapper: builds the 0/1 region-mask matrix, calls the kernel, then runs the
# tiny O(N*C*R) GeM-root / L2 / aggregate epilogue in plain JAX.
# ---------------------------------------------------------------------------
@functools.partial(jax.jit, static_argnames=("L", "p", "eps"))
def rpool_forward(x, *, L=3, p=3.0, eps=1e-6):
    N, C, H, W = x.shape
    HW = H * W
    regions = rmac_regions(H, W, L)
    R = len(regions)

    # ---- generation-aware VMEM / tile budget ------------------------------
    tpu_vmem = None
    try:
        tpu_vmem = int(pltpu.get_tpu_info().vmem_capacity_bytes)
    except Exception:
        tpu_vmem = None
    vmem_cap = tpu_vmem if tpu_vmem is not None else (64 << 20)   # conservative
    small_vmem = vmem_cap <= (64 << 20)                           # v7x-class core
    vmem_limit = min(vmem_cap * 3 // 4,
                     (48 << 20) if small_vmem else (100 << 20))
    target_block_bytes = (4 << 20) if small_vmem else (16 << 20)

    # ---- optional channel split: on a detected 64-MiB (2-TensorCore) chip
    # with N == 1 the batch axis alone leaves one core idle, so give the grid
    # a second 'parallel' axis over C tiles.
    split_c = (tpu_vmem is not None and small_vmem and N == 1
               and C >= 512 and C % 256 == 0)
    Ct = 256 if split_c else C
    nc = C // Ct

    # ---- HW tiling (lane axis); NO HBM padding of the feature map ---------
    itemsize = jnp.dtype(x.dtype).itemsize
    bytes_per_elem = 2 * itemsize + 16       # dbl-buffered input + f32 temporaries
    tk = (target_block_bytes // max(1, Ct * bytes_per_elem)) // 128 * 128
    tk = int(max(128, tk))
    hw128 = ((HW + 127) // 128) * 128
    tk = min(tk, hw128)                      # don't over-tile tiny maps
    nk = (HW + tk - 1) // tk
    HWp = nk * tk                            # mask rows (zero beyond HW)

    # ---- region masks: exact 0/1 (bf16-lossless); 1/area goes to epilogue --
    masks = np.zeros((R, H, W), dtype=np.float32)
    inv_area = np.zeros((R,), dtype=np.float32)
    for r, (i0, j0, hs, ws) in enumerate(regions):
        masks[r, i0:i0 + hs, j0:j0 + ws] = 1.0
        inv_area[r] = 1.0 / float(hs * ws)
    masks = masks.reshape(R, HW).T                              # [HW, R]
    if HWp > HW:
        masks = np.pad(masks, ((0, HWp - HW), (0, 0)))          # zero rows
    m = jnp.asarray(masks, dtype=jnp.bfloat16)
    inv_area = jnp.asarray(inv_area, dtype=jnp.float32)

    x_flat = jnp.reshape(x, (N, C, HW))                         # free reshape

    pooled = pl.pallas_call(
        functools.partial(_rpool_pool_kernel, p=float(p), eps=float(eps),
                          hw=HW, tk=tk),
        out_shape=jax.ShapeDtypeStruct((N, C, R), jnp.float32),
        grid=(N, nc, nk),
        in_specs=[
            pl.BlockSpec((1, Ct, tk), lambda n, c, k: (n, c, k)),
            pl.BlockSpec((HWp, R), lambda n, c, k: (0, 0)),     # resident mask
        ],
        out_specs=pl.BlockSpec((1, Ct, R), lambda n, c, k: (n, c, 0)),
        compiler_params=pltpu.CompilerParams(
            dimension_semantics=("parallel", "parallel", "arbitrary"),
            vmem_limit_bytes=int(vmem_limit),
        ),
    )(x_flat, m)                                                # [N, C, R] f32

    # ---- tiny epilogue (EUP/XLU work on ~N*C*R elements only) -------------
    gem = (pooled * inv_area[None, None, :]) ** (1.0 / float(p))      # GeM root
    o = gem / (jnp.sqrt(jnp.sum(gem * gem, axis=1, keepdims=True)) + eps)
    agg = jnp.sum(o, axis=2)                                          # [N, C]
    out = agg / (jnp.sqrt(jnp.sum(agg * agg, axis=1, keepdims=True)) + eps)
    return out.reshape(N, C, 1, 1).astype(x.dtype)


# ---------------------------------------------------------------------------
# Pure-JAX reference (mirrors the PyTorch forward with GeM rpool).
# ---------------------------------------------------------------------------
def rpool_reference(x, *, L=3, p=3.0, eps=1e-6):
    N, C, H, W = x.shape
    regions = rmac_regions(H, W, L)
    x = x.astype(jnp.float32)
    vecs = []
    for (i0, j0, hs, ws) in regions:
        crop = x[:, :, i0:i0 + hs, j0:j0 + ws]
        g = jnp.mean(jnp.maximum(crop, eps) ** p, axis=(2, 3)) ** (1.0 / p)  # [N, C]
        vecs.append(g)
    o = jnp.stack(vecs, axis=1)                                   # [N, R, C]
    o = o / (jnp.linalg.norm(o, axis=2, keepdims=True) + eps)
    agg = o.sum(axis=1)                                           # [N, C]
    out = agg / (jnp.linalg.norm(agg, axis=1, keepdims=True) + eps)
    return out.reshape(N, C, 1, 1)


if __name__ == "__main__":
    key = jax.random.PRNGKey(0)
    k1, k2 = jax.random.split(key)

    # Test 1: f32 features, HW divides the tile evenly.
    x1 = jax.random.normal(k1, (2, 4, 16, 16), dtype=jnp.float32)
    out1 = jax.block_until_ready(rpool_forward(x1, L=3, p=3.0, eps=1e-6))
    ref1 = rpool_reference(x1, L=3, p=3.0, eps=1e-6)
    np.testing.assert_allclose(np.asarray(jnp.asarray(out1, jnp.float32)),
                               np.asarray(ref1), rtol=1e-2, atol=1e-3)
    assert out1.shape == (2, 4, 1, 1)

    # Test 2: bf16 features, ragged last HW tile (HW = 225, not a 128 multiple).
    x2 = jax.random.normal(k2, (1, 8, 15, 15)).astype(jnp.bfloat16)
    out2 = jax.block_until_ready(rpool_forward(x2, L=3, p=3.0, eps=1e-6))
    ref2 = rpool_reference(x2, L=3, p=3.0, eps=1e-6)
    np.testing.assert_allclose(np.asarray(jnp.asarray(out2, jnp.float32)),
                               np.asarray(ref2), rtol=2e-2, atol=2e-3)
    assert out2.shape == (1, 8, 1, 1)

    print("KERNEL_OK")
</pallas_src>

<mosaic_0001>
module attributes {stable_mosaic.version = 11 : i64} {
  func.func @_rpool_pool_kernel(%arg0: i32, %arg1: i32, %arg2: i32, %arg3: memref<1x4x256xf32, #tpu.memory_space<vmem>>, %arg4: memref<256x15xbf16, #tpu.memory_space<vmem>>, %arg5: memref<1x4x15xf32, #tpu.memory_space<vmem>>) attributes {dimension_semantics = [#tpu.dimension_semantics<parallel>, #tpu.dimension_semantics<parallel>, #tpu.dimension_semantics<arbitrary>], iteration_bounds = array<i64: 2, 1, 1>, scalar_prefetch = 0 : i64, scratch_operands = 0 : i64, tpu.core_type = #tpu.core_type<tc>, window_params = [{transform_indices = @transform_0, window_bounds = array<i64: 1, 4, 256>}, {pipeline_mode = #tpu.pipeline_mode<synchronous>, transform_indices = @transform_1, window_bounds = array<i64: 256, 15>}, {transform_indices = @transform_2, window_bounds = array<i64: 1, 4, 15>}]} {
    %c0_i32 = arith.constant 0 : i32
    %0 = arith.cmpi eq, %arg2, %c0_i32 : i32
    %1 = arith.extui %0 : i1 to i32
    %c0_i32_0 = arith.constant 0 : i32
    %2 = arith.cmpi ne, %1, %c0_i32_0 : i32
    scf.if %2 {
      %cst_11 = arith.constant 0.000000e+00 : f32
      %21 = vector.broadcast %cst_11 : f32 to vector<1x4x15xf32>
      %c0_12 = arith.constant 0 : index
      %c0_13 = arith.constant 0 : index
      %c0_14 = arith.constant 0 : index
      %22 = vector.load %arg5[%c0_12, %c0_13, %c0_14] : memref<1x4x15xf32, #tpu.memory_space<vmem>>, vector<1x4x15xf32>
      tpu.vector_store %arg5[%c0_12, %c0_13, %c0_14], %21 {strides = array<i32>} : memref<1x4x15xf32, #tpu.memory_space<vmem>>, vector<1x4x15xf32>,
    } else {
    }
    %c0 = arith.constant 0 : index
    %c0_1 = arith.constant 0 : index
    %c0_2 = arith.constant 0 : index
    %3 = vector.load %arg3[%c0, %c0_1, %c0_2] : memref<1x4x256xf32, #tpu.memory_space<vmem>>, vector<1x4x256xf32>
    %4 = vector.shape_cast %3 : vector<1x4x256xf32> to vector<4x256xf32>
    %cst = arith.constant 9.99999997E-7 : f32
    %5 = vector.broadcast %cst : f32 to vector<4x256xf32>
    %6 = arith.maximumf %4, %5 : vector<4x256xf32>
    %7 = arith.mulf %6, %6 : vector<4x256xf32>
    %8 = arith.mulf %6, %7 : vector<4x256xf32>
    %c256_i32 = arith.constant 256 : i32
    %9 = arith.muli %arg2, %c256_i32 : i32
    %10 = tpu.assume_multiple %9, 128 : i32
    %11 = arith.index_cast %10 : i32 to index
    %c0_3 = arith.constant 0 : index
    %12 = vector.load %arg4[%11, %c0_3] : memref<256x15xbf16, #tpu.memory_space<vmem>>, vector<256x15xbf16>
    %c0_4 = arith.constant 0 : index
    %c0_5 = arith.constant 0 : index
    %c0_6 = arith.constant 0 : index
    %13 = vector.load %arg5[%c0_4, %c0_5, %c0_6] : memref<1x4x15xf32, #tpu.memory_space<vmem>>, vector<1x4x15xf32>
    %14 = vector.shape_cast %13 : vector<1x4x15xf32> to vector<4x15xf32>
    %15 = arith.truncf %8 : vector<4x256xf32> to vector<4x256xbf16>
    %cst_7 = arith.constant dense<0.000000e+00> : vector<4x15xf32>
    %16 = tpu.matmul %15, %12, %cst_7 {dimension_numbers = #tpu.dot_dimension_numbers<[1], [0], [0], [1], [0, 0, 1, 1], [], []>} : vector<4x256xbf16>, vector<256x15xbf16>, vector<4x15xf32> -> vector<4x15xf32>
    %17 = arith.addf %14, %16 : vector<4x15xf32>
    %c0_8 = arith.constant 0 : index
    %c0_9 = arith.constant 0 : index
    %c0_10 = arith.constant 0 : index
    %18 = vector.load %arg5[%c0_8, %c0_9, %c0_10] : memref<1x4x15xf32, #tpu.memory_space<vmem>>, vector<1x4x15xf32>
    %19 = vector.shape_cast %18 : vector<1x4x15xf32> to vector<4x15xf32>
    %20 = vector.shape_cast %17 : vector<4x15xf32> to vector<1x4x15xf32>
    tpu.vector_store %arg5[%c0_8, %c0_9, %c0_10], %20 {strides = array<i32>} : memref<1x4x15xf32, #tpu.memory_space<vmem>>, vector<1x4x15xf32>,
    return
  }
  func.func @transform_0(%arg0: i32, %arg1: i32, %arg2: i32) -> (i32, i32, i32) {
    %c0_i32 = arith.constant 0 : i32
    return %arg0, %arg1, %arg2 : i32, i32, i32
  }
  func.func @transform_1(%arg0: i32, %arg1: i32, %arg2: i32) -> (i32, i32) {
    %c0_i32 = arith.constant 0 : i32
    %c0_i32_0 = arith.constant 0 : i32
    %c0_i32_1 = arith.constant 0 : i32
    return %c0_i32, %c0_i32_0 : i32, i32
  }
  func.func @transform_2(%arg0: i32, %arg1: i32, %arg2: i32) -> (i32, i32, i32) {
    %c0_i32 = arith.constant 0 : i32
    %c0_i32_0 = arith.constant 0 : i32
    return %arg0, %arg1, %c0_i32 : i32, i32, i32
  }
}

</mosaic_0001>

<bundles_post_ra>
// kernel: rpool_forward.1
= control target key start
LH: loop header
LB: loop body
LE: loop exit
PB: predicated region body
PF: predicated region fallthrough
CT: control target
= control target key end

     0   :  { %s610_s9 = smov 0   ;;  %s612_s10 = smov 0   ;;  %s695_s0 = inlined_call_operand.vmem [shape: f32[2,4,256], index: 0, kind: input, shape index: {}]   ;;  %s696_s1 = inlined_call_operand.vmem [shape: bf16[256,15], index: 1, kind: input, shape index: {}]   ;;  %s697_s2 = inlined_call_operand.vmem [shape: f32[2,4,15], index: 2, kind: output, shape index: {}]  }
   0x1   :  { %s614_s11 = smov 0  }
   0x2 LB: > { %s31_s12 = sadd.s32 1, %s588_s10  ;;  %p484_p0 = scmp.ge.s32.totalorder %s592_s11, 1  ;;  %s592_s11 = sphi %s614_s11, %s12_s11   ;;  %s588_s10 = sphi %s612_s10, %s699_s10   ;;  %s584_s9 = sphi %s610_s9, %s698_s9  }
   0x3   : > { %p33_p1 = scmp.ge.s32.totalorder %s31_s12, 2  ;;  %p146_p2 = scmp.lt.s32.totalorder %s592_s11, 3 }
   0x5   : > { %s701_s12 = smov (%p33_p1, %s31_s12), 0  ;;  %p147_p3 = pnand %p484_p0, %p146_p2 }
   0x6   : > { %v554_v0 = vld [vmem:[%s696_s1 + $0x40] sm:$0xff] (!%p147_p3)   ;;  %v556_v2 = vld [vmem:[%s696_s1 + $0x48] sm:$0xff] (!%p147_p3)   ;;  %p179_p4 = scmp.lt.s32.totalorder (!%p147_p3), %s584_s9, 1  ;;  %v558_v4 = vld [vmem:[%s696_s1 + $0x50] sm:$0xff] (!%p147_p3)   ;;  %vm204_vm0 = vcmask (!%p147_p3), 117760   ;;  %v594_v23 = vmov (!%p147_p3), 0.0  }
   0x7   : > { %150 = sbr.rel (%p147_p3) target bundleno = 257 (0x101), region = 28  ;;  %v555_v1 = vld [vmem:[%s696_s1] sm:$0xff] (!%p147_p3)   ;;  %507 = vmatprep.subr.bf16.mxu0 (!%p147_p3), %v554_v0  ;;  %v557_v3 = vld [vmem:[%s696_s1 + $0x8] sm:$0xff] (!%p147_p3)   ;;  %v559_v5 = vld [vmem:[%s696_s1 + $0x10] sm:$0xff] (!%p147_p3)  }
   0x8   : > { %508 = vmatpush3.bf16.msra.mxu0 (!%p147_p3), %v555_v1  ;;  %v560_v6 = vld [vmem:[%s696_s1 + $0x58] sm:$0xff] (!%p147_p3)   ;;  %v562_v8 = vld [vmem:[%s696_s1 + $0x60] sm:$0xff] (!%p147_p3)   ;;  %v564_v10 = vld [vmem:[%s696_s1 + $0x68] sm:$0xff] (!%p147_p3)  }
   0x9   : > { %509 = vmatprep.subr.bf16.mxu0 (!%p147_p3), %v556_v2  ;;  %v561_v7 = vld [vmem:[%s696_s1 + $0x18] sm:$0xff] (!%p147_p3)   ;;  %v563_v9 = vld [vmem:[%s696_s1 + $0x20] sm:$0xff] (!%p147_p3)   ;;  %v565_v13 = vld [vmem:[%s696_s1 + $0x28] sm:$0xff] (!%p147_p3)  }
   0xa   : > { %v566_v15 = vld [vmem:[%s696_s1 + $0x70] sm:$0xff] (!%p147_p3)   ;;  %v568_v19 = vld [vmem:[%s696_s1 + $0x78] sm:$0xff] (!%p147_p3)  }
   0xb   : > { %v567_v17 = vld [vmem:[%s696_s1 + $0x30] sm:$0xff] (!%p147_p3)   ;;  %v569_v21 = vld [vmem:[%s696_s1 + $0x38] sm:$0xff] (!%p147_p3)  }
   0xc   : > { %510 = vmatpush3.bf16.msra.mxu0 (!%p147_p3), %v557_v3 }
   0xd   : > { %511 = vmatprep.subr.bf16.mxu0 (!%p147_p3), %v558_v4 }
   0xe   : > { %s703_s9 = smov (!%p179_p4, %s584_s9), 1 }
   0xf   : > { %s506_s27 = sshll.u32 %s703_s9, 3  ;;  %s487_s25 = sshll.u32 %s703_s9, 2 }
  0x10   : > { %512 = vmatpush3.bf16.msra.mxu0 %v559_v5  ;;  %s190_s6 = scalar_lea.vmem %s695_s0, %s506_s27  ;;  %s198_s28 = scalar_lea.vmem %s697_s2, %s487_s25 }
  0x11   : > { %513 = vmatprep.subr.bf16.mxu0 %v560_v6  ;;  %v206_v11 = vld [vmem:[%s190_s6] sm:$0xff]  ;;  %205 = vst.msk [vmem:[%s198_s28] sm:$0xf] %vm204_vm0, %v594_v23 }
  0x12   : > { %v207_v12 = vmax.f32 %v206_v11, 1e-06 }
  0x14   : > { %514 = vmatpush3.bf16.msra.mxu0 %v561_v7  ;;  %v208_v14 = vmul.f32 %v207_v12, %v207_v12 }
  0x15   : > { %515 = vmatprep.subr.bf16.mxu0 %v562_v8 }
  0x16   : > { %v209_v16 = vmul.f32 %v208_v14, %v207_v12 }
  0x18   : > { %516 = vmatpush3.bf16.msra.mxu0 %v563_v9  ;;  %v249_v18 = vcombine.high %v209_v16, %v209_v16  ;;  %v251_v22 = vpack.c.bf16 %v209_v16, %v209_v16  ;;  %v247_v25 = vld [vmem:[%s198_s28] sm:$0xf] }
  0x19   : > { %517 = vmatprep.subr.bf16.mxu0 %v564_v10 }
  0x1a   : > { %v252_v20 = vpack.c.bf16 %v249_v18, %v249_v18 }
  0x1c   : > { %518 = vmatpush3.bf16.msra.mxu0 %v565_v13  ;;  %381 = vmatprep.mubr.bf16.mxu0 %v252_v20 }
  0x1d   : > { %519 = vmatprep.subr.bf16.mxu0 %v566_v15 }
  0x20   : > { %520 = vmatpush3.bf16.msra.mxu0 %v567_v17 }
  0x21   : > { %521 = vmatprep.subr.bf16.mxu0 %v568_v19 }
  0x24   : > { %522 = vmatpush3.bf16.msra.mxu0 %v569_v21 }
  0x27   : > { %382 = vmatmul.mubr.bf16.vlgmr.msra.gmra.mrb[0].mxu0 %v251_v22 }
  0xfa   : > { %v523_v24 = vpop.f32.mrb[0].mxu0 }
  0xfb   : > { %v524_v26 = vpop.f32.mrb[1].mxu0 }
  0xfc   : > { %v525_v27 = vadd.f32 %v524_v26, %v523_v24  ;;  %v526_v28 = vpop.f32.mrb[2].mxu0 }
  0xfd   : > { %v527_v29 = vpop.f32.mrb[3].mxu0 }
  0xfe   : > { %v389_v30 = vadd.f32 %v525_v27, %v247_v25 }
 0x100   : > { %391 = vst.msk [vmem:[%s198_s28] sm:$0xf] %vm204_vm0, %v389_v30 }
 0x101 PF: > { %s12_s11 = sadd.s32 1, %s592_s11   ;;  %s698_s9 = smov %s588_s10 }
 0x102   : > { %p9_p5 = scmp.ge.s32.totalorder %s12_s11, 4   ;;  %s699_s10 = smov %s701_s12 }
 0x104   :  { %11 = sbr.rel (!%p9_p5) target bundleno = 2 (0x2), region = 63 }

</bundles_post_ra>
